<compile_context>
chip_gen: v5e
topology: v5e:2x2
jax: 0.10.0
libtpu: 0.0.40
codegen_flags: <defaults>
</compile_context>

<pallas_src>
import math
import functools

import jax
import jax.numpy as jnp
from jax.experimental import pallas as pl
from jax.experimental.pallas import tpu as pltpu


def _pe_dropout_kernel(seed_ref, x_ref, pe_ref, o_ref, *, p, training, batch, ts):
    # x_ref / o_ref: (TS, B*D)   pe_ref: (TS, D)   seed_ref: (1,) int32 (SMEM)
    x = x_ref[...]
    pe_t = pe_ref[...].astype(x.dtype)                      # (TS, D)
    # Lane-tile pe across the folded batch axis: out[:, b*D + d] uses pe[:, d].
    pe_bd = pe_t if batch == 1 else jnp.concatenate([pe_t] * batch, axis=-1)
    y = x + pe_bd                                           # (TS, B*D)

    if training and 0.0 < p < 1.0:
        # TODO(synk): dropout mask comes from a counter-based hash PRNG
        # (murmur3 finalizer) — identical keep-prob / 1/(1-p) scaling as
        # torch.nn.Dropout, but not torch's RNG bit pattern.
        base_row = pl.program_id(0) * ts
        rows = jax.lax.broadcasted_iota(jnp.int32, y.shape, 0) + base_row
        cols = jax.lax.broadcasted_iota(jnp.int32, y.shape, 1)
        h = (rows * y.shape[1] + cols).astype(jnp.uint32)
        h = h ^ seed_ref[0].astype(jnp.uint32)
        h = h ^ (h >> 16)
        h = h * jnp.uint32(0x85EBCA6B)
        h = h ^ (h >> 13)
        h = h * jnp.uint32(0xC2B2AE35)
        h = h ^ (h >> 16)
        thr = jnp.uint32(min(int(p * (1 << 32)), (1 << 32) - 1))   # drop prob p
        keep = h >= thr                                            # keep prob 1-p
        y = jnp.where(keep, y * (1.0 / (1.0 - p)), 0.0).astype(y.dtype)
    elif training and p >= 1.0:
        y = jnp.zeros_like(y)

    o_ref[...] = y.astype(o_ref.dtype)


def make_pe_table(d_model: int, max_len: int) -> jax.Array:
    # Matches the PyTorch __init__ buffer construction (float32).
    pos = jnp.arange(max_len, dtype=jnp.float32)[:, None]
    div = jnp.exp(jnp.arange(0, d_model, 2, dtype=jnp.float32)
                  * (-math.log(10000.0) / d_model))
    pe = jnp.zeros((max_len, 1, d_model), dtype=jnp.float32)
    pe = pe.at[:, 0, 0::2].set(jnp.sin(pos * div))
    pe = pe.at[:, 0, 1::2].set(jnp.cos(pos * div))
    return pe


def positional_encoding_forward(x, pe, *, dropout_p=0.25, training=True, seed=0):
    seq_len = x.shape[1]                  # matches PyTorch: x.size(1)
    assert x.shape[0] == seq_len, (
        "PyTorch broadcast in this module requires x.shape[0] == x.shape[1]")
    S, B, D = x.shape
    BD = B * D

    # Lane-dense 2-D views (free reshapes in XLA).
    x2 = x.reshape(S, BD)
    pe2 = pe.reshape(pe.shape[0], pe.shape[2])              # (max_len, D)
    if pe2.dtype != x.dtype:
        # Cast only the rows we actually need (keeps compute + pe DMA in x.dtype).
        pe2 = pe2[:S].astype(x.dtype)

    # Tile-size selection: double-buffered footprint ≈ 2*(x_tile + out_tile + pe_tile).
    itemsize = jnp.dtype(x.dtype).itemsize
    per_row = (2 * BD + D) * itemsize
    budget = 12 * 1024 * 1024             # fits v5e 16 MiB default & v7x 64 MiB VMEM
    ts = max(8, min(1024, budget // (2 * per_row)))
    ts = (ts // 8) * 8                    # sublane multiple of 8

    if S % 8 == 0:
        ts = min(ts, S)
        pe_in = pe2                       # full table; index_map bounds the access
    else:
        # Fallback for small / odd seq_len: one full-array block per operand.
        ts = S
        pe_in = pe2[:S]

    grid = (pl.cdiv(S, ts),)

    kernel = functools.partial(_pe_dropout_kernel, p=float(dropout_p),
                               training=bool(training), batch=B, ts=ts)
    grid_spec = pltpu.PrefetchScalarGridSpec(
        num_scalar_prefetch=1,            # seed lands in SMEM
        grid=grid,
        in_specs=[
            pl.BlockSpec((ts, BD), lambda i, seed_ref: (i, 0)),
            pl.BlockSpec((ts, D), lambda i, seed_ref: (i, 0)),
        ],
        out_specs=pl.BlockSpec((ts, BD), lambda i, seed_ref: (i, 0)),
    )
    out2 = pl.pallas_call(
        kernel,
        out_shape=jax.ShapeDtypeStruct((S, BD), x.dtype),
        grid_spec=grid_spec,
        compiler_params=pltpu.CompilerParams(
            dimension_semantics=("parallel",),
            vmem_limit_bytes=32 * 1024 * 1024),
    )(jnp.array([seed], dtype=jnp.int32), x2, pe_in)
    return out2.reshape(S, B, D)


if __name__ == "__main__":
    d_model = 32
    S = B = 8                             # seq == batch so the module's broadcast is valid
    key = jax.random.PRNGKey(0)
    x = jax.random.normal(key, (S, B, d_model), dtype=jnp.float32)

    # TODO(synk): max_len shrunk from 1_000_000 to 2048 for the demo; forward
    # semantics are identical for any seq_len <= max_len.
    pe = make_pe_table(d_model, max_len=2048)

    # Pure-JAX reference of the positional-encoding add (pre-dropout).
    ref = x + pe[:B]

    # Eval path (dropout is identity) — must match the reference exactly.
    out_eval = jax.block_until_ready(
        positional_encoding_forward(x, pe, training=False))
    assert out_eval.shape == (S, B, d_model)
    assert jnp.allclose(out_eval, ref, atol=1e-6), "eval-path mismatch"

    # Training path (dropout p=0.25): each element is either exactly 0 or
    # ref / (1 - p), and roughly 75% of elements are kept.
    out_train = jax.block_until_ready(
        positional_encoding_forward(x, pe, training=True, seed=1234))
    kept = out_train != 0.0
    assert jnp.allclose(jnp.where(kept, out_train, 0.0),
                        jnp.where(kept, ref / 0.75, 0.0), atol=1e-5), \
        "train-path scaling mismatch"
    keep_rate = float(jnp.mean(kept.astype(jnp.float32)))
    assert 0.55 < keep_rate < 0.92, f"implausible dropout keep rate {keep_rate}"

    print("KERNEL_OK")
</pallas_src>

<mosaic_0001>
module attributes {stable_mosaic.version = 11 : i64} {
  func.func @_pe_dropout_kernel(%arg0: i32, %arg1: memref<1xi32, #tpu.memory_space<smem>>, %arg2: memref<8x256xf32, #tpu.memory_space<vmem>>, %arg3: memref<8x32xf32, #tpu.memory_space<vmem>>, %arg4: memref<8x256xf32, #tpu.memory_space<vmem>>) attributes {dimension_semantics = [#tpu.dimension_semantics<parallel>], iteration_bounds = array<i64: 1>, scalar_prefetch = 1 : i64, scratch_operands = 0 : i64, tpu.core_type = #tpu.core_type<tc>, window_params = [{transform_indices = @transform_0, window_bounds = array<i64: 8, 256>}, {transform_indices = @transform_1, window_bounds = array<i64: 8, 32>}, {transform_indices = @transform_2, window_bounds = array<i64: 8, 256>}]} {
    %c0 = arith.constant 0 : index
    %c0_0 = arith.constant 0 : index
    %0 = vector.load %arg2[%c0, %c0_0] : memref<8x256xf32, #tpu.memory_space<vmem>>, vector<8x256xf32>
    %c0_1 = arith.constant 0 : index
    %c0_2 = arith.constant 0 : index
    %1 = vector.load %arg3[%c0_1, %c0_2] : memref<8x32xf32, #tpu.memory_space<vmem>>, vector<8x32xf32>
    %2 = tpu.concatenate %1, %1, %1, %1, %1, %1, %1, %1 in 1 : vector<8x32xf32>, vector<8x32xf32>, vector<8x32xf32>, vector<8x32xf32>, vector<8x32xf32>, vector<8x32xf32>, vector<8x32xf32>, vector<8x32xf32> -> vector<8x256xf32>
    %3 = arith.addf %0, %2 : vector<8x256xf32>
    %c0_3 = arith.constant 0 : index
    %c0_4 = arith.constant 0 : index
    %4 = vector.load %arg4[%c0_3, %c0_4] : memref<8x256xf32, #tpu.memory_space<vmem>>, vector<8x256xf32>
    tpu.vector_store %arg4[%c0_3, %c0_4], %3 {strides = array<i32>} : memref<8x256xf32, #tpu.memory_space<vmem>>, vector<8x256xf32>,
    return
  }
  func.func @transform_0(%arg0: i32, %arg1: memref<1xi32, #tpu.memory_space<smem>>) -> (i32, i32) {
    %c0_i32 = arith.constant 0 : i32
    %c0_i32_0 = arith.constant 0 : i32
    return %arg0, %c0_i32 : i32, i32
  }
  func.func @transform_1(%arg0: i32, %arg1: memref<1xi32, #tpu.memory_space<smem>>) -> (i32, i32) {
    %c0_i32 = arith.constant 0 : i32
    %c0_i32_0 = arith.constant 0 : i32
    return %arg0, %c0_i32 : i32, i32
  }
  func.func @transform_2(%arg0: i32, %arg1: memref<1xi32, #tpu.memory_space<smem>>) -> (i32, i32) {
    %c0_i32 = arith.constant 0 : i32
    %c0_i32_0 = arith.constant 0 : i32
    return %arg0, %c0_i32 : i32, i32
  }
}

</mosaic_0001>

<bundles_post_ra>
// kernel: tpu_custom_call.1
= control target key start
LH: loop header
LB: loop body
LE: loop exit
PB: predicated region body
PF: predicated region fallthrough
CT: control target
= control target key end

     0   :  { %s119_s0 = inlined_call_operand.<no memory space> [shape: s32[1], index: 0, kind: input, shape index: {}]   ;;  %s120_s1 = inlined_call_operand.vmem [shape: f32[8,256], index: 1, kind: input, shape index: {}]   ;;  %s121_s2 = inlined_call_operand.vmem [shape: f32[2048,32], index: 2, kind: input, shape index: {}]   ;;  %s122_s3 = inlined_call_operand.hbm [shape: f32[8,256], index: 3, kind: output, shape index: {}]  }
   0x1   :  { %v16_v0 = vld [vmem:[%s121_s2] sm:$0xff] }
   0x2   :  { %9 = vsyncpa [#allocation5], 0  ;;  %s83_s14 = smov 32   ;;  %s84_s15 = smov 96   ;;  %vm27_vm0 = vcmask 261120   ;;  %vm29_vm1 = vcmask 523264  }
   0x3   :  { %18 = vrot.lane.b32.xlu0 %v16_v0, %s83_s14  ;;  %24 = vrot.lane.b32.xlu1 %v16_v0, %s84_s15  ;;  %s85_s16 = smov 64   ;;  %vm31_vm2 = vcmask 785408   ;;  %v14_v5 = vld [vmem:[%s120_s1] sm:$0xff]  ;;  %v15_v6 = vld [vmem:[%s120_s1 + $0x8] sm:$0xff]  ;;  %s86_s19 = smov [#allocation4]  }
   0x4   :  { %s42_s20 = sshll.u32 %s86_s19, 4  ;;  %s44_s23 = sshll.u32 %s122_s3, 4  ;;  %s43_s20 = int_to_ptr.vmem [resolvable:$true] %s42_s20  ;;  %s45_s23 = int_to_ptr.hbm [resolvable:$true] %s44_s23 }
   0xb   :  { %21 = vrot.lane.b32.xlu0 %v16_v0, %s85_s16 }
  0x75   :  { %v19_v1 = vpop.permute.xlu0 %18  ;;  %v25_v2 = vpop.permute.xlu1 %24 }
  0x76   :  { %v28_v3 = vsel %vm27_vm0, %v16_v0, %v19_v1 }
  0x7d   :  { %v22_v4 = vpop.permute.xlu0 %21 }
  0x7e   :  { %v30_v7 = vsel %vm29_vm1, %v28_v3, %v22_v4 }
  0x7f   :  { %v32_v8 = vsel %vm31_vm2, %v30_v7, %v25_v2 }
  0x80   :  { %v33_v9 = vadd.f32 %v32_v8, %v14_v5  ;;  %v34_v10 = vadd.f32 %v32_v8, %v15_v6 }
  0x82   :  { %35 = vst [vmem:[#allocation4] sm:$0xff] %v33_v9 }
  0x83   :  { %36 = vst [vmem:[#allocation4 + $0x8] sm:$0xff] %v34_v10 }
  0x84   :  { %47 = dma.vmem_to_hbm [thread:$0]  %s43_s20, 256, %s45_s23, [#allocation5]  }
  0x85   :  { %81 = dma.done.wait [#allocation5], 256  }
  0x86   :  { %82 = vsyncadd [#allocation5], 4294967040 }
  0x87   :  { %52 = vsyncpa [#allocation5], 1 }

</bundles_post_ra>
